<compile_context>
chip_gen: v5e
topology: v5e:2x2
jax: 0.10.0
libtpu: 0.0.40
codegen_flags: <defaults>
</compile_context>

<pallas_src>
import jax
import jax.numpy as jnp
from jax import lax
from jax.experimental import pallas as pl
from jax.experimental.pallas import tpu as pltpu

_BN_EPS = 1e-5
_VMEM_LIMIT = 48 * 1024 * 1024  # fits v7x (64 MiB) and raises v5e/v6e defaults


def _pick_div(n, target):
    """Largest divisor of n that is <= target."""
    for d in range(min(n, target), 0, -1):
        if n % d == 0:
            return d
    return n


def _pick_row_tile(rows, target=512):
    """Row tile for the lane-dense BN kernel: full rows, or a mult-of-8 divisor."""
    if rows <= target:
        return rows
    for d in range(target, 7, -1):
        if rows % d == 0 and d % 8 == 0:
            return d
    return rows


def _pick_channel_tile(c):
    if c <= 128 or c % 128 != 0:
        return c
    return 128


# --------------------------------------------------------------------------
# Kernel 1: 3x3 conv (stride 1, pad 1) on a halo'd row tile + per-tile BN sums
# --------------------------------------------------------------------------
def _conv3x3_stats_kernel(xt_ref, w_ref, out_ref, ss_ref):
    # xt_ref : (1, th+2, W+2, Cin)  bf16   (halo'd row tile of the padded input)
    # w_ref  : (9, Cin, Cout)       bf16
    # out_ref: (1, th, W, Cout)     f32    (raw conv output, pre-BN)
    # ss_ref : (1, 2, Cout)         f32    (per-tile [sum, sum_of_squares])
    th, W, Cout = out_ref.shape[1], out_ref.shape[2], out_ref.shape[3]

    def row_body(h, carry):
        s1, s2 = carry
        acc = jnp.zeros((W, Cout), jnp.float32)
        for dy in range(3):
            row = xt_ref[0, h + dy]                       # (W+2, Cin) bf16
            for dx in range(3):
                acc = acc + jnp.dot(row[dx:dx + W, :], w_ref[3 * dy + dx],
                                    preferred_element_type=jnp.float32)
        out_ref[0, h] = acc
        s1 = s1 + jnp.sum(acc, axis=0, keepdims=True)     # (1, Cout)
        s2 = s2 + jnp.sum(acc * acc, axis=0, keepdims=True)
        return (s1, s2)

    s1, s2 = lax.fori_loop(
        0, th, row_body,
        (jnp.zeros((1, Cout), jnp.float32), jnp.zeros((1, Cout), jnp.float32)))
    ss_ref[0] = jnp.concatenate([s1, s2], axis=0)


def conv3x3_stats(x, w9):
    """x: (N,H,W,Cin) bf16; w9: (9,Cin,Cout) bf16.
    Returns (raw conv output f32 (N,H,W,Cout), BN sums f32 (2,Cout))."""
    N, H, W, Cin = x.shape
    Cout = w9.shape[-1]
    Wp = W + 2
    th = _pick_div(H, 32)
    nt = H // th

    xp = jnp.pad(x, ((0, 0), (1, 1), (1, 1), (0, 0)))
    # overlapping row tiles with a 1-row halo on each side (duplicates only 2 rows/tile)
    idx = jnp.arange(nt)[:, None] * th + jnp.arange(th + 2)[None, :]
    tiles = xp[:, idx].reshape(N * nt, th + 2, Wp, Cin)

    conv_raw, stats = pl.pallas_call(
        _conv3x3_stats_kernel,
        out_shape=(jax.ShapeDtypeStruct((N * nt, th, W, Cout), jnp.float32),
                   jax.ShapeDtypeStruct((N * nt, 2, Cout), jnp.float32)),
        grid=(N * nt,),
        in_specs=[pl.BlockSpec((1, th + 2, Wp, Cin), lambda i: (i, 0, 0, 0)),
                  pl.BlockSpec((9, Cin, Cout), lambda i: (0, 0, 0))],
        out_specs=(pl.BlockSpec((1, th, W, Cout), lambda i: (i, 0, 0, 0)),
                   pl.BlockSpec((1, 2, Cout), lambda i: (i, 0, 0))),
        compiler_params=pltpu.CompilerParams(
            dimension_semantics=("parallel",),
            vmem_limit_bytes=_VMEM_LIMIT),
    )(tiles, w9)

    conv_raw = conv_raw.reshape(N, H, W, Cout)
    return conv_raw, jnp.sum(stats, axis=0)


def _bn_affine(sums, count, gamma, beta):
    """Fold training-mode BN (batch stats, biased var) into a per-channel affine."""
    mean = sums[0] / count
    var = jnp.maximum(sums[1] / count - mean * mean, 0.0)
    scale = gamma * lax.rsqrt(var + _BN_EPS)
    return scale, beta - mean * scale


# --------------------------------------------------------------------------
# Kernel 2: BN-affine + ReLU + bilinear upsample + depthwise 1x1 + residual add
#   (W-axis neighbors gathered in the wrapper on the small pre-upsample tensor;
#    H-axis interpolation done in-kernel with static prev/cur/next coefficients)
# --------------------------------------------------------------------------
def _make_upsample_kernel(h_coeffs):
    f = len(h_coeffs)

    def kernel(b0_ref, b1_ref, fw_ref, sc_ref, sh_ref, dw_ref, skip_ref, out_ref):
        sc = sc_ref[0, 0]                     # (1, tc)
        sh = sh_ref[0, 0]
        dw = dw_ref[0, 0]
        # BN affine + ReLU applied to the two W-neighbor values (ReLU commutes
        # with the gather, and is applied before the linear bilinear blend, as
        # in the PyTorch module).
        u0 = jnp.maximum(b0_ref[0].astype(jnp.float32) * sc + sh, 0.0)   # (H, Wo, tc)
        u1 = jnp.maximum(b1_ref[0].astype(jnp.float32) * sc + sh, 0.0)
        fw = fw_ref[0, 0]                     # (Wo, 1)
        yw = u0 * (1.0 - fw) + u1 * fw        # W-axis interpolated, (H, Wo, tc)

        # H-axis bilinear (align_corners=False) as prev/cur/next with clamping.
        yp = jnp.concatenate([yw[:1], yw[:-1]], axis=0)
        yn = jnp.concatenate([yw[1:], yw[-1:]], axis=0)
        slabs = []
        for (p, c, n) in h_coeffs:            # static python floats
            s = c * yw
            if p != 0.0:
                s = s + p * yp
            if n != 0.0:
                s = s + n * yn
            slabs.append(s[:, None])          # (H, 1, Wo, tc)
        y = jnp.concatenate(slabs, axis=1) if f > 1 else slabs[0]
        H = yw.shape[0]
        y = y.reshape(H * f, yw.shape[1], yw.shape[2])                    # (Ho, Wo, tc)

        # depthwise 1x1 conv (per-channel scale) + residual add with layers[i-1]
        out_ref[0] = (y * dw + skip_ref[0].astype(jnp.float32)).astype(out_ref.dtype)

    return kernel


def _source_index(n_out, n_in, f):
    # PyTorch nn.Upsample(mode='bilinear', align_corners=False) index math
    src = (jnp.arange(n_out, dtype=jnp.float32) + 0.5) / float(f) - 0.5
    src = jnp.maximum(src, 0.0)
    i0 = jnp.minimum(jnp.floor(src).astype(jnp.int32), n_in - 1)
    i1 = jnp.minimum(i0 + 1, n_in - 1)
    frac = src - i0.astype(jnp.float32)
    return i0, i1, frac


def upsample_bn_relu_dw_add(conv_raw, bn_scale, bn_shift, f, dw, skip):
    """conv_raw: raw proj-conv output (N,H,W,C) f32. Applies BN affine + ReLU,
    bilinear x f upsample, depthwise 1x1 conv (scale dw), + skip. Returns bf16."""
    N, H, W, C = conv_raw.shape
    Ho, Wo = H * f, W * f

    # W-axis neighbor gathers on the small pre-upsample tensor (each 1/f of output)
    i0w, i1w, fw = _source_index(Wo, W, f)
    b0 = jnp.take(conv_raw, i0w, axis=2)      # (N, H, Wo, C)
    b1 = jnp.take(conv_raw, i1w, axis=2)
    fw_arr = fw.reshape(1, 1, Wo, 1)

    # H-axis prev/cur/next coefficients (static, exact PyTorch align_corners=False math)
    coeffs = []
    for r in range(f):
        t = (2 * r + 1 - f) / (2.0 * f)
        p = max(-t, 0.0)
        n = max(t, 0.0)
        coeffs.append((p, 1.0 - p - n, n))

    tc = _pick_channel_tile(C)
    nc = C // tc
    sc = bn_scale.reshape(1, 1, 1, C)
    sh = bn_shift.reshape(1, 1, 1, C)
    dw4 = dw.reshape(1, 1, 1, C)

    # TODO(synk): for very large feature maps also tile H (needs a 1-row halo).
    return pl.pallas_call(
        _make_upsample_kernel(tuple(coeffs)),
        out_shape=jax.ShapeDtypeStruct((N, Ho, Wo, C), jnp.bfloat16),
        grid=(N, nc),
        in_specs=[
            pl.BlockSpec((1, H, Wo, tc), lambda n, c: (n, 0, 0, c)),
            pl.BlockSpec((1, H, Wo, tc), lambda n, c: (n, 0, 0, c)),
            pl.BlockSpec((1, 1, Wo, 1), lambda n, c: (0, 0, 0, 0)),
            pl.BlockSpec((1, 1, 1, tc), lambda n, c: (0, 0, 0, c)),
            pl.BlockSpec((1, 1, 1, tc), lambda n, c: (0, 0, 0, c)),
            pl.BlockSpec((1, 1, 1, tc), lambda n, c: (0, 0, 0, c)),
            pl.BlockSpec((1, Ho, Wo, tc), lambda n, c: (n, 0, 0, c)),
        ],
        out_specs=pl.BlockSpec((1, Ho, Wo, tc), lambda n, c: (n, 0, 0, c)),
        compiler_params=pltpu.CompilerParams(
            dimension_semantics=("parallel", "parallel"),
            vmem_limit_bytes=_VMEM_LIMIT),
    )(b0, b1, fw_arr, sc, sh, dw4, skip)


# --------------------------------------------------------------------------
# Kernel 3: BN affine + ReLU on a lane-dense (rows, W*C) view of the conv output
# --------------------------------------------------------------------------
def _bn_relu_kernel(x_ref, sc_ref, sh_ref, o_ref):
    o_ref[...] = jnp.maximum(
        x_ref[...] * sc_ref[...] + sh_ref[...], 0.0).astype(o_ref.dtype)


def bn_relu(conv_raw, scale, shift, out_dtype):
    N, H, W, C = conv_raw.shape
    WC = W * C
    R = N * H
    x2 = conv_raw.reshape(R, WC)                       # free, contiguity-preserving
    sc = jnp.tile(scale, W).reshape(1, WC)             # per-channel params tiled over W
    sh = jnp.tile(shift, W).reshape(1, WC)
    tr = _pick_row_tile(R)

    out = pl.pallas_call(
        _bn_relu_kernel,
        out_shape=jax.ShapeDtypeStruct((R, WC), out_dtype),
        grid=(R // tr,),
        in_specs=[pl.BlockSpec((tr, WC), lambda i: (i, 0)),
                  pl.BlockSpec((1, WC), lambda i: (0, 0)),
                  pl.BlockSpec((1, WC), lambda i: (0, 0))],
        out_specs=pl.BlockSpec((tr, WC), lambda i: (i, 0)),
        compiler_params=pltpu.CompilerParams(
            dimension_semantics=("parallel",),
            vmem_limit_bytes=_VMEM_LIMIT),
    )(x2, sc, sh)
    return out.reshape(N, H, W, C)


# --------------------------------------------------------------------------
# IDAUp module (parameters initialized deterministically in-script)
# --------------------------------------------------------------------------
class IDAUpPallas:
    def __init__(self, o, channels, up_f, key):
        self.o = o
        self.channels = list(channels)
        self.up_f = [int(f) for f in up_f]
        self.params = {}
        for i in range(1, len(channels)):
            c = channels[i]
            key, k1, k2, k3 = jax.random.split(key, 4)
            # proj_i : Conv2d(c, o, 3, pad=1) + BN + ReLU
            # (conv bias omitted: exactly cancelled by training-mode BN mean subtraction)
            self.params['proj_%d' % i] = dict(
                w9=(0.1 * jax.random.normal(k1, (3, 3, c, o), jnp.float32)
                    ).reshape(9, c, o).astype(jnp.bfloat16),
                gamma=jnp.ones((o,), jnp.float32),
                beta=jnp.zeros((o,), jnp.float32))
            # up_i : Upsample(bilinear, f) + Conv2d(o, o, 1, groups=o, bias=False)
            self.params['up_%d' % i] = dict(
                dw=0.5 + 0.1 * jax.random.normal(k2, (o,), jnp.float32))
            # node_i : Conv2d(o, o, 3, pad=1) + BN + ReLU
            self.params['node_%d' % i] = dict(
                w9=(0.1 * jax.random.normal(k3, (3, 3, o, o), jnp.float32)
                    ).reshape(9, o, o).astype(jnp.bfloat16),
                gamma=jnp.ones((o,), jnp.float32),
                beta=jnp.zeros((o,), jnp.float32))

    def __call__(self, layers, startp, endp):
        layers = list(layers)
        for i in range(startp + 1, endp):
            j = i - startp
            x = layers[i]

            # proj: 3x3 conv (bf16 MXU) + streamed BN stats
            p = self.params['proj_%d' % j]
            conv_raw, sums = conv3x3_stats(x.astype(jnp.bfloat16), p['w9'])
            count = x.shape[0] * x.shape[1] * x.shape[2]
            scale, shift = _bn_affine(sums, count, p['gamma'], p['beta'])

            # up: fused BN affine + ReLU + bilinear xf + depthwise 1x1 + skip add
            u = self.params['up_%d' % j]
            summed = upsample_bn_relu_dw_add(conv_raw, scale, shift,
                                             self.up_f[j], u['dw'],
                                             layers[i - 1])

            # node: 3x3 conv (input already bf16) + BN + ReLU
            n = self.params['node_%d' % j]
            conv_raw2, sums2 = conv3x3_stats(summed, n['w9'])
            count2 = summed.shape[0] * summed.shape[1] * summed.shape[2]
            scale2, shift2 = _bn_affine(sums2, count2, n['gamma'], n['beta'])
            layers[i] = bn_relu(conv_raw2, scale2, shift2, jnp.float32)
        return layers


if __name__ == "__main__":
    key = jax.random.PRNGKey(0)
    key, kp, k0, k1, k2 = jax.random.split(key, 5)

    o = 8
    channels = [8, 4, 16]   # channels[0] is the already-projected skip level
    up_f = [1, 2, 4]

    ida = IDAUpPallas(o, channels, up_f, kp)

    # layers (NHWC): level 0 already has o channels at full resolution.
    layers = [
        jax.random.normal(k0, (2, 16, 16, 8), jnp.float32),
        jax.random.normal(k1, (2, 8, 8, 4), jnp.float32),
        jax.random.normal(k2, (2, 4, 4, 16), jnp.float32),
    ]

    out_layers = ida(layers, startp=0, endp=3)
    for y in out_layers:
        jax.block_until_ready(y)

    assert out_layers[1].shape == (2, 16, 16, 8)
    assert out_layers[2].shape == (2, 16, 16, 8)
    assert out_layers[1].dtype == jnp.float32
    assert bool(jnp.all(jnp.isfinite(out_layers[1])))
    assert bool(jnp.all(jnp.isfinite(out_layers[2])))
    print("KERNEL_OK")
</pallas_src>

<mosaic_0001>
module attributes {stable_mosaic.version = 11 : i64} {
  func.func @_conv3x3_stats_kernel(%arg0: i32, %arg1: memref<1x10x10x4xbf16, #tpu.memory_space<vmem>>, %arg2: memref<9x4x8xbf16, #tpu.memory_space<vmem>>, %arg3: memref<1x8x8x8xf32, #tpu.memory_space<vmem>>, %arg4: memref<1x2x8xf32, #tpu.memory_space<vmem>>) attributes {dimension_semantics = [#tpu.dimension_semantics<parallel>], iteration_bounds = array<i64: 2>, scalar_prefetch = 0 : i64, scratch_operands = 0 : i64, tpu.core_type = #tpu.core_type<tc>, window_params = [{transform_indices = @transform_0, window_bounds = array<i64: 1, 10, 10, 4>}, {pipeline_mode = #tpu.pipeline_mode<synchronous>, transform_indices = @transform_1, window_bounds = array<i64: 9, 4, 8>}, {transform_indices = @transform_2, window_bounds = array<i64: 1, 8, 8, 8>}, {transform_indices = @transform_3, window_bounds = array<i64: 1, 2, 8>}]} {
    %cst = arith.constant 0.000000e+00 : f32
    %0 = vector.broadcast %cst : f32 to vector<1x8xf32>
    %cst_0 = arith.constant 0.000000e+00 : f32
    %1 = vector.broadcast %cst_0 : f32 to vector<1x8xf32>
    %c0_i32 = arith.constant 0 : i32
    %c8_i32 = arith.constant 8 : i32
    %2 = arith.addi %c0_i32, %c8_i32 : i32
    %c1_i32 = arith.constant 1 : i32
    %3:2 = scf.for %arg5 = %c0_i32 to %2 step %c1_i32 iter_args(%arg6 = %0, %arg7 = %1) -> (vector<1x8xf32>, vector<1x8xf32>)  : i32 {
      %cst_4 = arith.constant 0.000000e+00 : f32
      %8 = vector.broadcast %cst_4 : f32 to vector<8x8xf32>
      %c0_i32_5 = arith.constant 0 : i32
      %9 = arith.addi %arg5, %c0_i32_5 : i32
      %c0_6 = arith.constant 0 : index
      %10 = arith.index_cast %9 : i32 to index
      %c0_7 = arith.constant 0 : index
      %c0_8 = arith.constant 0 : index
      %11 = vector.load %arg1[%c0_6, %10, %c0_7, %c0_8] : memref<1x10x10x4xbf16, #tpu.memory_space<vmem>>, vector<1x1x10x4xbf16>
      %12 = vector.shape_cast %11 : vector<1x1x10x4xbf16> to vector<10x4xbf16>
      %13 = vector.extract_strided_slice %12 {offsets = [0, 0], sizes = [8, 4], strides = [1, 1]} : vector<10x4xbf16> to vector<8x4xbf16>
      %c0_9 = arith.constant 0 : index
      %c0_10 = arith.constant 0 : index
      %c0_11 = arith.constant 0 : index
      %14 = vector.load %arg2[%c0_9, %c0_10, %c0_11] : memref<9x4x8xbf16, #tpu.memory_space<vmem>>, vector<1x4x8xbf16>
      %15 = vector.shape_cast %14 : vector<1x4x8xbf16> to vector<4x8xbf16>
      %cst_12 = arith.constant dense<0.000000e+00> : vector<8x8xf32>
      %16 = tpu.matmul %13, %15, %cst_12 {dimension_numbers = #tpu.dot_dimension_numbers<[1], [0], [0], [1], [0, 0, 1, 1], [], []>} : vector<8x4xbf16>, vector<4x8xbf16>, vector<8x8xf32> -> vector<8x8xf32>
      %17 = arith.addf %8, %16 : vector<8x8xf32>
      %18 = vector.extract_strided_slice %12 {offsets = [1, 0], sizes = [8, 4], strides = [1, 1]} : vector<10x4xbf16> to vector<8x4xbf16>
      %c1 = arith.constant 1 : index
      %c0_13 = arith.constant 0 : index
      %c0_14 = arith.constant 0 : index
      %19 = vector.load %arg2[%c1, %c0_13, %c0_14] : memref<9x4x8xbf16, #tpu.memory_space<vmem>>, vector<1x4x8xbf16>
      %20 = vector.shape_cast %19 : vector<1x4x8xbf16> to vector<4x8xbf16>
      %cst_15 = arith.constant dense<0.000000e+00> : vector<8x8xf32>
      %21 = tpu.matmul %18, %20, %cst_15 {dimension_numbers = #tpu.dot_dimension_numbers<[1], [0], [0], [1], [0, 0, 1, 1], [], []>} : vector<8x4xbf16>, vector<4x8xbf16>, vector<8x8xf32> -> vector<8x8xf32>
      %22 = arith.addf %17, %21 : vector<8x8xf32>
      %23 = vector.extract_strided_slice %12 {offsets = [2, 0], sizes = [8, 4], strides = [1, 1]} : vector<10x4xbf16> to vector<8x4xbf16>
      %c2 = arith.constant 2 : index
      %c0_16 = arith.constant 0 : index
      %c0_17 = arith.constant 0 : index
      %24 = vector.load %arg2[%c2, %c0_16, %c0_17] : memref<9x4x8xbf16, #tpu.memory_space<vmem>>, vector<1x4x8xbf16>
      %25 = vector.shape_cast %24 : vector<1x4x8xbf16> to vector<4x8xbf16>
      %cst_18 = arith.constant dense<0.000000e+00> : vector<8x8xf32>
      %26 = tpu.matmul %23, %25, %cst_18 {dimension_numbers = #tpu.dot_dimension_numbers<[1], [0], [0], [1], [0, 0, 1, 1], [], []>} : vector<8x4xbf16>, vector<4x8xbf16>, vector<8x8xf32> -> vector<8x8xf32>
      %27 = arith.addf %22, %26 : vector<8x8xf32>
      %c1_i32_19 = arith.constant 1 : i32
      %28 = arith.addi %arg5, %c1_i32_19 : i32
      %c0_20 = arith.constant 0 : index
      %29 = arith.index_cast %28 : i32 to index
      %c0_21 = arith.constant 0 : index
      %c0_22 = arith.constant 0 : index
      %30 = vector.load %arg1[%c0_20, %29, %c0_21, %c0_22] : memref<1x10x10x4xbf16, #tpu.memory_space<vmem>>, vector<1x1x10x4xbf16>
      %31 = vector.shape_cast %30 : vector<1x1x10x4xbf16> to vector<10x4xbf16>
      %32 = vector.extract_strided_slice %31 {offsets = [0, 0], sizes = [8, 4], strides = [1, 1]} : vector<10x4xbf16> to vector<8x4xbf16>
      %c3 = arith.constant 3 : index
      %c0_23 = arith.constant 0 : index
      %c0_24 = arith.constant 0 : index
      %33 = vector.load %arg2[%c3, %c0_23, %c0_24] : memref<9x4x8xbf16, #tpu.memory_space<vmem>>, vector<1x4x8xbf16>
      %34 = vector.shape_cast %33 : vector<1x4x8xbf16> to vector<4x8xbf16>
      %cst_25 = arith.constant dense<0.000000e+00> : vector<8x8xf32>
      %35 = tpu.matmul %32, %34, %cst_25 {dimension_numbers = #tpu.dot_dimension_numbers<[1], [0], [0], [1], [0, 0, 1, 1], [], []>} : vector<8x4xbf16>, vector<4x8xbf16>, vector<8x8xf32> -> vector<8x8xf32>
      %36 = arith.addf %27, %35 : vector<8x8xf32>
      %37 = vector.extract_strided_slice %31 {offsets = [1, 0], sizes = [8, 4], strides = [1, 1]} : vector<10x4xbf16> to vector<8x4xbf16>
      %c4 = arith.constant 4 : index
      %c0_26 = arith.constant 0 : index
      %c0_27 = arith.constant 0 : index
      %38 = vector.load %arg2[%c4, %c0_26, %c0_27] : memref<9x4x8xbf16, #tpu.memory_space<vmem>>, vector<1x4x8xbf16>
      %39 = vector.shape_cast %38 : vector<1x4x8xbf16> to vector<4x8xbf16>
      %cst_28 = arith.constant dense<0.000000e+00> : vector<8x8xf32>
      %40 = tpu.matmul %37, %39, %cst_28 {dimension_numbers = #tpu.dot_dimension_numbers<[1], [0], [0], [1], [0, 0, 1, 1], [], []>} : vector<8x4xbf16>, vector<4x8xbf16>, vector<8x8xf32> -> vector<8x8xf32>
      %41 = arith.addf %36, %40 : vector<8x8xf32>
      %42 = vector.extract_strided_slice %31 {offsets = [2, 0], sizes = [8, 4], strides = [1, 1]} : vector<10x4xbf16> to vector<8x4xbf16>
      %c5 = arith.constant 5 : index
      %c0_29 = arith.constant 0 : index
      %c0_30 = arith.constant 0 : index
      %43 = vector.load %arg2[%c5, %c0_29, %c0_30] : memref<9x4x8xbf16, #tpu.memory_space<vmem>>, vector<1x4x8xbf16>
      %44 = vector.shape_cast %43 : vector<1x4x8xbf16> to vector<4x8xbf16>
      %cst_31 = arith.constant dense<0.000000e+00> : vector<8x8xf32>
      %45 = tpu.matmul %42, %44, %cst_31 {dimension_numbers = #tpu.dot_dimension_numbers<[1], [0], [0], [1], [0, 0, 1, 1], [], []>} : vector<8x4xbf16>, vector<4x8xbf16>, vector<8x8xf32> -> vector<8x8xf32>
      %46 = arith.addf %41, %45 : vector<8x8xf32>
      %c2_i32 = arith.constant 2 : i32
      %47 = arith.addi %arg5, %c2_i32 : i32
      %c0_32 = arith.constant 0 : index
      %48 = arith.index_cast %47 : i32 to index
      %c0_33 = arith.constant 0 : index
      %c0_34 = arith.constant 0 : index
      %49 = vector.load %arg1[%c0_32, %48, %c0_33, %c0_34] : memref<1x10x10x4xbf16, #tpu.memory_space<vmem>>, vector<1x1x10x4xbf16>
      %50 = vector.shape_cast %49 : vector<1x1x10x4xbf16> to vector<10x4xbf16>
      %51 = vector.extract_strided_slice %50 {offsets = [0, 0], sizes = [8, 4], strides = [1, 1]} : vector<10x4xbf16> to vector<8x4xbf16>
      %c6 = arith.constant 6 : index
      %c0_35 = arith.constant 0 : index
      %c0_36 = arith.constant 0 : index
      %52 = vector.load %arg2[%c6, %c0_35, %c0_36] : memref<9x4x8xbf16, #tpu.memory_space<vmem>>, vector<1x4x8xbf16>
      %53 = vector.shape_cast %52 : vector<1x4x8xbf16> to vector<4x8xbf16>
      %cst_37 = arith.constant dense<0.000000e+00> : vector<8x8xf32>
      %54 = tpu.matmul %51, %53, %cst_37 {dimension_numbers = #tpu.dot_dimension_numbers<[1], [0], [0], [1], [0, 0, 1, 1], [], []>} : vector<8x4xbf16>, vector<4x8xbf16>, vector<8x8xf32> -> vector<8x8xf32>
      %55 = arith.addf %46, %54 : vector<8x8xf32>
      %56 = vector.extract_strided_slice %50 {offsets = [1, 0], sizes = [8, 4], strides = [1, 1]} : vector<10x4xbf16> to vector<8x4xbf16>
      %c7 = arith.constant 7 : index
      %c0_38 = arith.constant 0 : index
      %c0_39 = arith.constant 0 : index
      %57 = vector.load %arg2[%c7, %c0_38, %c0_39] : memref<9x4x8xbf16, #tpu.memory_space<vmem>>, vector<1x4x8xbf16>
      %58 = vector.shape_cast %57 : vector<1x4x8xbf16> to vector<4x8xbf16>
      %cst_40 = arith.constant dense<0.000000e+00> : vector<8x8xf32>
      %59 = tpu.matmul %56, %58, %cst_40 {dimension_numbers = #tpu.dot_dimension_numbers<[1], [0], [0], [1], [0, 0, 1, 1], [], []>} : vector<8x4xbf16>, vector<4x8xbf16>, vector<8x8xf32> -> vector<8x8xf32>
      %60 = arith.addf %55, %59 : vector<8x8xf32>
      %61 = vector.extract_strided_slice %50 {offsets = [2, 0], sizes = [8, 4], strides = [1, 1]} : vector<10x4xbf16> to vector<8x4xbf16>
      %c8 = arith.constant 8 : index
      %c0_41 = arith.constant 0 : index
      %c0_42 = arith.constant 0 : index
      %62 = vector.load %arg2[%c8, %c0_41, %c0_42] : memref<9x4x8xbf16, #tpu.memory_space<vmem>>, vector<1x4x8xbf16>
      %63 = vector.shape_cast %62 : vector<1x4x8xbf16> to vector<4x8xbf16>
      %cst_43 = arith.constant dense<0.000000e+00> : vector<8x8xf32>
      %64 = tpu.matmul %61, %63, %cst_43 {dimension_numbers = #tpu.dot_dimension_numbers<[1], [0], [0], [1], [0, 0, 1, 1], [], []>} : vector<8x4xbf16>, vector<4x8xbf16>, vector<8x8xf32> -> vector<8x8xf32>
      %65 = arith.addf %60, %64 : vector<8x8xf32>
      %c0_44 = arith.constant 0 : index
      %66 = arith.index_cast %arg5 : i32 to index
      %c0_45 = arith.constant 0 : index
      %c0_46 = arith.constant 0 : index
      %67 = vector.load %arg3[%c0_44, %66, %c0_45, %c0_46] : memref<1x8x8x8xf32, #tpu.memory_space<vmem>>, vector<1x1x8x8xf32>
      %68 = vector.shape_cast %67 : vector<1x1x8x8xf32> to vector<8x8xf32>
      %69 = vector.shape_cast %65 : vector<8x8xf32> to vector<1x1x8x8xf32>
      tpu.vector_store %arg3[%c0_44, %66, %c0_45, %c0_46], %69 {strides = array<i32>} : memref<1x8x8x8xf32, #tpu.memory_space<vmem>>, vector<1x1x8x8xf32>,
      %cst_47 = arith.constant dense<0.000000e+00> : vector<8xf32>
      %70 = vector.multi_reduction <add>, %65, %cst_47 [0] : vector<8x8xf32> to vector<8xf32>
      %71 = vector.shape_cast %70 : vector<8xf32> to vector<1x8xf32>
      %72 = arith.addf %arg6, %71 : vector<1x8xf32>
      %73 = arith.mulf %65, %65 : vector<8x8xf32>
      %cst_48 = arith.constant dense<0.000000e+00> : vector<8xf32>
      %74 = vector.multi_reduction <add>, %73, %cst_48 [0] : vector<8x8xf32> to vector<8xf32>
      %75 = vector.shape_cast %74 : vector<8xf32> to vector<1x8xf32>
      %76 = arith.addf %arg7, %75 : vector<1x8xf32>
      scf.yield %72, %76 : vector<1x8xf32>, vector<1x8xf32>
    }
    %c8_i32_1 = arith.constant 8 : i32
    %4 = tpu.concatenate %3#0, %3#1 in 0 : vector<1x8xf32>, vector<1x8xf32> -> vector<2x8xf32>
    %c0 = arith.constant 0 : index
    %c0_2 = arith.constant 0 : index
    %c0_3 = arith.constant 0 : index
    %5 = vector.load %arg4[%c0, %c0_2, %c0_3] : memref<1x2x8xf32, #tpu.memory_space<vmem>>, vector<1x2x8xf32>
    %6 = vector.shape_cast %5 : vector<1x2x8xf32> to vector<2x8xf32>
    %7 = vector.shape_cast %4 : vector<2x8xf32> to vector<1x2x8xf32>
    tpu.vector_store %arg4[%c0, %c0_2, %c0_3], %7 {strides = array<i32>} : memref<1x2x8xf32, #tpu.memory_space<vmem>>, vector<1x2x8xf32>,
    return
  }
  func.func @transform_0(%arg0: i32) -> (i32, i32, i32, i32) {
    %c0_i32 = arith.constant 0 : i32
    %c0_i32_0 = arith.constant 0 : i32
    %c0_i32_1 = arith.constant 0 : i32
    %c0_i32_2 = arith.constant 0 : i32
    return %arg0, %c0_i32, %c0_i32_0, %c0_i32_1 : i32, i32, i32, i32
  }
  func.func @transform_1(%arg0: i32) -> (i32, i32, i32) {
    %c0_i32 = arith.constant 0 : i32
    %c0_i32_0 = arith.constant 0 : i32
    %c0_i32_1 = arith.constant 0 : i32
    %c0_i32_2 = arith.constant 0 : i32
    return %c0_i32, %c0_i32_0, %c0_i32_1 : i32, i32, i32
  }
  func.func @transform_2(%arg0: i32) -> (i32, i32, i32, i32) {
    %c0_i32 = arith.constant 0 : i32
    %c0_i32_0 = arith.constant 0 : i32
    %c0_i32_1 = arith.constant 0 : i32
    %c0_i32_2 = arith.constant 0 : i32
    return %arg0, %c0_i32, %c0_i32_0, %c0_i32_1 : i32, i32, i32, i32
  }
  func.func @transform_3(%arg0: i32) -> (i32, i32, i32) {
    %c0_i32 = arith.constant 0 : i32
    %c0_i32_0 = arith.constant 0 : i32
    %c0_i32_1 = arith.constant 0 : i32
    return %arg0, %c0_i32, %c0_i32_0 : i32, i32, i32
  }
}

</mosaic_0001>

<bundles_post_ra>
// kernel: tpu_custom_call.1
= control target key start
LH: loop header
LB: loop body
LE: loop exit
PB: predicated region body
PF: predicated region fallthrough
CT: control target
= control target key end

     0   :  { %9 = vsyncpa [#allocation3], 0  ;;  %s1089_s0 = inlined_call_operand.vmem [shape: bf16[2,10,10,4], index: 0, kind: input, shape index: {}]   ;;  %s1090_s1 = inlined_call_operand.vmem [shape: bf16[9,4,8], index: 1, kind: input, shape index: {}]   ;;  %s1091_s2 = inlined_call_operand.hbm [shape: f32[2,8,8,8], index: 2, kind: output, shape index: {0}]   ;;  %s1092_s3 = inlined_call_operand.hbm [shape: f32[2,2,8], index: 3, kind: output, shape index: {1}]  }
   0x1   :  { %11 = vsyncpa [#allocation3 + $0x1], 0 }
   0x2   :  { %12 = vsyncpa [#allocation5], 0 }
   0x3   :  { %14 = vsyncpa [#allocation5 + $0x1], 0  ;;  %s888_s12 = smov 0   ;;  %s890_s13 = smov 0  }
   0x4   :  { %s892_s14 = smov 0   ;;  %s894_s15 = smov 0  }
   0x5 LB: > { %s909_s16 = sadd.s32 4294967295, %s852_s15   ;;  %s618_s17 = sadd.s32 4294967294, %s852_s15   ;;  %s852_s15 = sphi %s894_s15, %s1100_s15   ;;  %s848_s14 = sphi %s892_s14, %s1099_s14   ;;  %s844_s13 = sphi %s890_s13, %s1098_s13   ;;  %s840_s12 = sphi %s888_s12, %s1097_s12  }
   0x6   : > { %s913_s18 = sadd.s32 1, %s852_s15   ;;  %s74_s19 = sadd.s32 1, %s848_s14 }
   0x7   : > { %s71_s20 = ssub.s32 %s852_s15, %s913_s18  ;;  %p84_p0 = scmp.ne.s32.totalorder %s848_s14, %s844_s13 }
   0x8   : > { %p72_p1 = scmp.eq.s32.totalorder %s71_s20, 0  ;;  %p85_p2 = scmp.eq.s32.totalorder %s909_s16, 1 }
   0x9   : > { %p90_p3 = scmp.ne.s32.totalorder %s844_s13, %s840_s12  ;;  %p91_p4 = scmp.eq.s32.totalorder %s618_s17, 1 }
   0xa   : > { %s924_s21 = scalar_select %p72_p1, %s848_s14, %s74_s19  }
   0xb   : > { %p926_p5 = por %p85_p2, %p84_p0  ;;  %p930_p6 = por %p91_p4, %p90_p3 }
   0xc   : > { %p621_p7 = scmp.ge.s32.totalorder %s852_s15, 1  ;;  %p146_p8 = scmp.lt.s32.totalorder %s852_s15, 3 }
   0xe   : > { %p147_p9 = pnand %p621_p7, %p146_p8 }
   0xf   : > { %s937_s24 = sand.u32 (!%p147_p9), 1, %s844_s13   ;;  %p175_p10 = scmp.lt.s32.totalorder (!%p147_p9), %s909_s16, 1 }
  0x10   : > { %150 = sbr.rel (%p147_p9) target bundleno = 236 (0xec), region = 28  ;;  %s622_s25 = sshll.u32 (!%p147_p9), %s937_s24, 6 }
  0x11   : > { %s623_s26 = sshll.u32 (!%p147_p9), %s937_s24, 1  ;;  %s948_s5 = scalar_lea.vmem (!%p147_p9), [#allocation2], %s622_s25 }
  0x12   : > { %s950_s6 = scalar_lea.vmem (!%p147_p9), [#allocation4], %s623_s26  ;;  %s956_s7 = smov (!%p147_p9), 0  }
  0x15   : > { %s176_s27 = scalar_select %p175_p10, %s909_s16, 1  ;;  %v952_v0 = vmov 0.0   ;;  %v954_v1 = vmov 0.0  }
  0x17   : > { %s675_s28 = smul.u32 80, %s176_s27 }
  0x19   : > { %s946_s4 = scalar_lea.vmem %s1089_s0, %s675_s28 }
  0x1a LB: >> { %vm213_vm0 = vcmask 1041408   ;;  %v634_v2 = vld [vmem:[%s1090_s1 + $0x4] sm:$0x3]  ;;  %v639_v3 = vld [vmem:[%s1090_s1 + $0x6] sm:$0x3]  ;;  %s670_s26 = sshll.u32 %s864_s7, 3  ;;  %s864_s7 = sphi %s956_s7, %s186_s7   ;;  %v860_v1 = vphi %v954_v1, %v1096_v1   ;;  %v856_v0 = vphi %v952_v0, %v1095_v0  }
  0x1b   : >> { %v256_v4 = vsel %vm213_vm0, %v634_v2, 0  ;;  %v284_v5 = vsel %vm213_vm0, %v639_v3, 0  ;;  %v627_v6 = vld [vmem:[%s1090_s1 + $0x2] sm:$0x3]  ;;  %v194_v7 = vld [vmem:[%s1090_s1] sm:$0x3]  ;;  %s990_s29 = scalar_lea.vmem %s946_s4, %s670_s26  ;;  %s443_s25 = scalar_lea.vmem %s948_s5, %s670_s26 [#allocation2] }
  0x1c   : >> { %265 = vmatpush.bf16.msra.mxu2 %v256_v4  ;;  %293 = vmatpush.bf16.msra.mxu3 %v284_v5  ;;  %v215_v8 = vsel %vm213_vm0, %v627_v6, 0  ;;  %v234_v9 = vsel %vm213_vm0, %v194_v7, 0  ;;  %v641_v10 = vld [vmem:[%s1090_s1 + $0x8] sm:$0x3]  ;;  %vm209_vm1 = vcmask 31744   ;;  %vm444_vm2 = vcmask 64512  }
  0x1d   : >> { %224 = vmatpush.bf16.msra.mxu0 %v215_v8  ;;  %243 = vmatpush.bf16.msra.mxu1 %v234_v9  ;;  %v318_v11 = vsel %vm213_vm0, %v641_v10, 0  ;;  %v652_v12 = vld [vmem:[%s1090_s1 + $0xc] sm:$0x3]  ;;  %v654_v13 = vld [vmem:[%s1090_s1 + $0xe] sm:$0x3]  ;;  %s186_s7 = sadd.s32 1, %s864_s7  }
  0x1e   : >> { %v630_v14 = vld [vmem:[%s990_s29] sm:$0xf]  ;;  %v671_v15 = vld [vmem:[%s990_s29] sm:$0x10]  ;;  %v637_v16 = vld [vmem:[%s990_s29 + $0x8] sm:$0xf] }
  0x1f   : >> { %v631_v17 = vor.u32 %v671_v15, %v630_v14  ;;  %640 = vmatmul.msk.bf16.vlgmr.msra.gmra.mxu3 %vm209_vm1, %v637_v16  ;;  %v192_v18 = vld [vmem:[%s990_s29] sm:$0xf]  ;;  %v369_v19 = vsel %vm213_vm0, %v652_v12, 0  ;;  %v403_v20 = vsel %vm213_vm0, %v654_v13, 0  ;;  %v647_v21 = vld [vmem:[%s1090_s1 + $0xa] sm:$0x3] }
  0x20   : >> { %633 = vmatmul.msk.bf16.vlgmr.msra.gmra.mxu1 %vm209_vm1, %v192_v18  ;;  %378 = vmatpush.bf16.msrb.mxu2 %v369_v19  ;;  %v341_v22 = vsel %vm213_vm0, %v647_v21, 0  ;;  %v657_v26 = vld [vmem:[%s990_s29 + $0x10] sm:$0xf]  ;;  %v673_v27 = vld [vmem:[%s990_s29 + $0x10] sm:$0x10]  ;;  %p183_p11 = scmp.ge.s32.totalorder %s186_s7, 8  }
  0x21   : >> { %327 = vmatpush.bf16.msrb.mxu0 %v318_v11  ;;  %v251_v23 = vrot.slane %v631_v17, 1  ;;  %v203_v24 = vshrl.u32 %v631_v17, 16  ;;  %v205_v25 = vshll.u32 %v631_v17, 16  ;;  %412 = vmatpush.bf16.msrb.mxu3 %v403_v20  ;;  %v660_v28 = vld [vmem:[%s1090_s1 + $0x10] sm:$0x3]  ;;  %v658_v30 = vor.u32 %v673_v27, %v657_v26  ;;  %s674_s26 = sshll.u32 (%p183_p11), %s909_s16, 6 }
  0x22   : >> { %350 = vmatpush.bf16.msrb.mxu1 %v341_v22  ;;  %v644_v31 = vld [vmem:[%s990_s29 + $0x8] sm:$0xf]  ;;  %v672_v32 = vld [vmem:[%s990_s29 + $0x8] sm:$0x10]  ;;  %v426_v35 = vsel %vm213_vm0, %v660_v28, 0  ;;  %vm463_vm3 = vcmask (%p183_p11), 1040384  }
  0x23   : >> { %635 = vmatmul.msk.bf16.vlgmr.msra.gmra.mxu2 %vm209_vm1, %v251_v23  ;;  %v207_v29 = vrot.slane %v205_v25, 1  ;;  %v395_v34 = vshll.u32 %v658_v30, 16  ;;  %v645_v36 = vor.u32 %v672_v32, %v644_v31  ;;  %v393_v37 = vshrl.u32 %v658_v30, 16  ;;  %v650_v44 = vld [vmem:[%s990_s29 + $0x10] sm:$0xf]  ;;  %s484_s29 = scalar_lea.hbm (%p183_p11), %s1091_s2, %s674_s26  ;;  %s485_s30 = sshll.u32 (%p183_p11), %s948_s5, 4  ;;  %s486_s30 = int_to_ptr.vmem [resolvable:$true] %s485_s30 }
  0x24   : >> { %v421_v46 = vrot.slane %v658_v30, 1  ;;  %vm465_vm4 = vcmask (%p183_p11), 58368   ;;  %s487_s8 = sshll.u32 (%p183_p11), %s484_s29, 4  ;;  %s468_s7 = scalar_lea.sflag (%p183_p11), [#allocation3], %s937_s24  ;;  %s488_s8 = int_to_ptr.hbm [resolvable:$true] %s487_s8 }
  0x25   : >> { %v208_v33 = vor.u32 %v207_v29, %v203_v24  ;;  %v397_v38 = vrot.slane %v395_v34, 1  ;;  %v310_v39 = vshll.u32 %v645_v36, 16  ;;  %v336_v41 = vrot.slane %v645_v36, 1  ;;  %s760_s9 = sshra.s32 (%p183_p11), %s488_s8, 4  ;;  %s766_s17 = scalar_lea.hbm (%p183_p11), %s1091_s2, 128  ;;  %s761_s9 = int_to_ptr.hbm [resolvable:$true] %s760_s9 }
  0x26   : >> { %v308_v42 = vshrl.u32 %v645_v36, 16  ;;  %s762_s4 = scalar_lea.hbm (%p183_p11), %s761_s9, 64  ;;  %p767_p1 = scmp.lt.s32.totalorder (%p183_p11), %s761_s9, %s1091_s2 }
  0x27   : >> { %632 = vmatmul.msk.bf16.vlgmr.msra.gmra.mxu0 %vm209_vm1, %v208_v33  ;;  %v398_v40 = vor.u32 %v397_v38, %v393_v37  ;;  %v312_v43 = vrot.slane %v310_v39, 1  ;;  %p763_p12 = scmp.ne.s32.totalorder (%p183_p11), %s761_s9, %s762_s4  ;;  %p768_p2 = scmp.lt.s32.totalorder (%p183_p11), %s766_s17, %s762_s4 }
  0x28   : >> { %435 = vmatpush.bf16.msra.mxu0 %v426_v35 }
  0x29   : >> { %v313_v45 = vor.u32 %v312_v43, %v308_v42  ;;  %p764_p13 = pnand (%p183_p11), %p763_p12, %p926_p5  ;;  %p769_p3 = por (%p183_p11), %p768_p2, %p767_p1 }
  0x2b   : > { %p765_p0 = pneg (%p183_p11), %p764_p13 }
  0x2d   : > { %p770_p4 = pnand (%p183_p11), %p769_p3, %p765_p0 }
  0x2f   : >> { %659 = vmatmul.msk.bf16.vlgmr.msrb.gmra.mxu3 %vm209_vm1, %v398_v40 }
  0x30   : >> { %648 = vmatmul.msk.bf16.vlgmr.msrb.gmra.mxu1 %vm209_vm1, %v336_v41 }
  0x33   : >> { %653 = vmatmul.msk.bf16.vlgmr.msrb.gmra.mxu2 %vm209_vm1, %v650_v44 }
  0x37   : >> { %646 = vmatmul.msk.bf16.vlgmr.msrb.gmra.mxu0 %vm209_vm1, %v313_v45 }
  0x47   : >> { %661 = vmatmul.msk.bf16.vlgmr.msra.gmra.mxu0 %vm209_vm1, %v421_v46 }
  0x9d   : >> { %v245_v47 = vpop.f32.mrf.mxu1 }
  0xa2   : >> { %v295_v48 = vpop.f32.mrf.mxu3 }
  0xa4   : >> { %v226_v49 = vpop.f32.mrf.mxu0 }
  0xa5   : >> { %v247_v50 = vpop.f32.mrf.mxu1  ;;  %v246_v54 = vadd.f32 %v245_v47, %v226_v49 }
  0xa6   : >> { %v267_v51 = vpop.f32.mrf.mxu2 }
  0xa7   : >> { %v271_v57 = vadd.f32 %v267_v51, %v246_v54 }
  0xa9   : >> { %v299_v60 = vadd.f32 %v295_v48, %v271_v57 }
  0xaa   : >> { %v297_v52 = vpop.f32.mrf.mxu3 }
  0xac   : >> { %v228_v53 = vpop.f32.mrf.mxu0 }
  0xad   : >> { %v352_v55 = vpop.f32.mrf.mxu1 }
  0xae   : >> { %v269_v56 = vpop.f32.mrf.mxu2 }
  0xb2   : >> { %v414_v58 = vpop.f32.mrf.mxu3 }
  0xb4   : >> { %v329_v59 = vpop.f32.mrf.mxu0 }
  0xb5   : >> { %v354_v61 = vpop.f32.mrf.mxu1  ;;  %v333_v63 = vadd.f32 %v329_v59, %v299_v60 }
  0xb6   : >> { %v380_v62 = vpop.f32.mrf.mxu2 }
  0xb7   : >> { %v356_v3 = vadd.f32 %v352_v55, %v333_v63 }
  0xb9   : >> { %v384_v6 = vadd.f32 %v380_v62, %v356_v3 }
  0xba   : >> { %v416_v2 = vpop.f32.mrf.mxu3 }
  0xbb   : >> { %v418_v7 = vadd.f32 %v414_v58, %v384_v6 }
  0xbc   : >> { %v331_v4 = vpop.f32.mrf.mxu0 }
  0xbe   : >> { %v382_v5 = vpop.f32.mrf.mxu2 }
  0xc4   : >> { %v437_v8 = vpop.f32.mrf.mxu0 }
  0xc5   : >> { %v441_v9 = vadd.f32 %v437_v8, %v418_v7 }
  0xc7   : >> { %445 = vst.msk [vmem:[%s443_s25] sm:$0xff] %vm444_vm2, %v441_v9  ;;  %v446_v10 = vsel %vm444_vm2, %v441_v9, 0.0  ;;  %v454_v11 = vmul.f32 %v441_v9, %v441_v9 }
  0xc8   : >> { %v447_v12 = vrot.slane %v446_v10, 4 }
  0xc9   : >> { %v455_v13 = vsel %vm444_vm2, %v454_v11, 0.0 }
  0xca   : >> { %v448_v14 = vadd.f32 %v447_v12, %v446_v10  ;;  %v456_v15 = vrot.slane %v455_v13, 4 }
  0xcc   : >> { %v449_v16 = vrot.slane %v448_v14, 2  ;;  %v457_v17 = vadd.f32 %v456_v15, %v455_v13  ;;  %v439_v18 = vpop.f32.mrf.mxu0 }
  0xce   : >> { %v450_v19 = vadd.f32 %v449_v16, %v448_v14  ;;  %v458_v20 = vrot.slane %v457_v17, 2 }
  0xd0   : >> { %v451_v21 = vrot.slane %v450_v19, 1  ;;  %v459_v22 = vadd.f32 %v458_v20, %v457_v17 }
  0xd2   : >> { %v452_v23 = vadd.f32 %v451_v21, %v450_v19  ;;  %v460_v24 = vrot.slane %v459_v22, 1 }
  0xd4   : >> { %v453_v25 = vadd.f32 %v860_v1, %v452_v23   ;;  %v461_v26 = vadd.f32 %v460_v24, %v459_v22  ;;  %185 = sbr.rel (!%p183_p11) target bundleno = 26 (0x1a), region = 99 }
  0xd6   : >> { %v462_v27 = vadd.f32 %v856_v0, %v461_v26   ;;  %v1096_v1 = vmov %v453_v25 }
  0xd8   : >> { %v1095_v0 = vmov %v462_v27  ;;  %v464_v1 = vsel (%p183_p11), %vm463_vm3, %v453_v25, %v462_v27 }
  0xd9   : > { %466 = vst.msk [vmem:[%s950_s6] sm:$0x3] %vm465_vm4, %v464_v1 }
  0xda   : > { %773 = shalt.err (!%p770_p4)
}
  0xdb   : > { %s866_s5 = smov 128   ;;  %s867_s25 = smov 8  }
  0xdc   : > { %676 = dma.vmem_to_hbm [thread:$0]  (%p926_p5), %s486_s30, 1024, %s488_s8, %s468_s7, %s866_s5, %s866_s5, %s867_s25  }
  0xdd   : > { %s667_s26 = sshll.u32 %s909_s16, 1  ;;  %s502_s27 = sshll.u32 %s950_s6, 4  ;;  %s503_s27 = int_to_ptr.vmem [resolvable:$true] %s502_s27 }
  0xde   : > { %s500_s10 = scalar_lea.hbm %s1092_s3, %s667_s26  ;;  %s473_s4 = scalar_lea.sflag [#allocation5], %s937_s24 }
  0xdf   : > { %s504_s9 = sshll.u32 %s500_s10, 4  ;;  %s794_s16 = scalar_lea.hbm %s1092_s3, 4  ;;  %s505_s9 = int_to_ptr.hbm [resolvable:$true] %s504_s9 }
  0xe0   : > { %s788_s11 = sshra.s32 %s505_s9, 4  ;;  %s789_s11 = int_to_ptr.hbm [resolvable:$true] %s788_s11 }
  0xe1   : > { %s790_s17 = scalar_lea.hbm %s789_s11, 2  ;;  %p795_p10 = scmp.lt.s32.totalorder %s789_s11, %s1092_s3 }
  0xe2   : > { %p791_p7 = scmp.ne.s32.totalorder %s789_s11, %s790_s17  ;;  %p796_p11 = scmp.lt.s32.totalorder %s794_s16, %s790_s17 }
  0xe4   : > { %p792_p8 = pnand %p791_p7, %p926_p5  ;;  %p797_p12 = por %p796_p11, %p795_p10 }
  0xe6   : > { %p793_p9 = pneg %p792_p8 }
  0xe8   : > { %p798_p13 = pnand %p797_p12, %p793_p9 }
  0xea   : > { %801 = shalt.err (!%p798_p13)
}
  0xeb   : > { %677 = dma.vmem_to_hbm [thread:$0]  (%p926_p5), %s503_s27, 32, %s505_s9, %s473_s4  }
  0xec PF: > { %p687_p0 = scmp.ge.s32.totalorder %s852_s15, 2  ;;  %s516_s24 = sand.u32 1, %s840_s12  }
  0xed   : > { %s517_s8 = scalar_lea.sflag [#allocation3], %s516_s24 }
  0xee   : > { %p681_p1 = pnand %p687_p0, %p930_p6 }
  0xf0   : > { %p682_p2 = pneg %p681_p1 }
  0xf2   : > { %831 = dma.done.wait (%p682_p2), %s517_s8, 1024  }
  0xf3   : > { %833 = vsyncadd (%p682_p2), %s517_s8, 4294966272  ;;  %s527_s7 = scalar_lea.sflag [#allocation5], %s516_s24 }
  0xf4   : > { %835 = dma.done.wait (%p682_p2), %s527_s7, 32  }
  0xf5   : > { %837 = vsyncadd (%p682_p2), %s527_s7, 4294967264  ;;  %p17_p5 = scmp.ge.s32.totalorder %s913_s18, 4   ;;  %s1097_s12 = smov %s844_s13 }
  0xf6   : > { %s1098_s13 = smov %s848_s14  ;;  %s1099_s14 = smov %s924_s21 }
  0xf7   : > { %s1100_s15 = smov %s913_s18  ;;  %19 = sbr.rel (!%p17_p5) target bundleno = 5 (0x5), region = 110 }
  0xfc   :  { %533 = vsyncpa [#allocation3], 1 }
  0xfd   :  { %535 = vsyncpa [#allocation3 + $0x1], 1 }
  0xfe   :  { %536 = vsyncpa [#allocation5], 1 }
  0xff   :  { %538 = vsyncpa [#allocation5 + $0x1], 1 }

</bundles_post_ra>
